<compile_context>
chip_gen: v7x
topology: tpu7x:2x2x1
jax: 0.10.0
libtpu: 0.0.40
codegen_flags: <defaults>
</compile_context>

<pallas_src>
import functools

import jax
import jax.numpy as jnp
from jax import lax
from jax.experimental import pallas as pl
from jax.experimental.pallas import tpu as pltpu

_EPS = 1e-5
_TAPS = tuple((dy, dx) for dy in range(3) for dx in range(3))


# ---------------------------------------------------------------------------
# In-kernel building blocks (operate on VMEM values / scratch refs)
# ---------------------------------------------------------------------------

def _conv3x3(xn, xpad_ref, w_ref, scale):
    """'same' 3x3 conv of xn (H, W, IC) with w_ref (9, IC, OC) -> (H*W, OC) f32.

    The zero-padded image lives in a VMEM scratch; the conv is 9 shifted
    (H*W, IC) @ (IC, OC) MXU matmuls accumulated in f32 -- no im2col in HBM.
    """
    H, W, IC = xn.shape
    OC = w_ref.shape[-1]
    xpad_ref[...] = jnp.zeros_like(xpad_ref)
    xpad_ref[1:H + 1, 1:W + 1, :] = xn
    acc = jnp.zeros((H * W, OC), jnp.float32)
    for t, (dy, dx) in enumerate(_TAPS):
        patch = xpad_ref[dy:dy + H, dx:dx + W, :]
        acc = acc + jnp.dot(patch.reshape(H * W, IC), w_ref[t],
                            preferred_element_type=jnp.float32)
    return acc * scale


def _normalize(v, axis, eps=_EPS):
    v = v.astype(jnp.float32)
    mean = jnp.mean(v, axis=axis, keepdims=True)
    var = jnp.mean(jnp.square(v - mean), axis=axis, keepdims=True)
    return (v - mean) * lax.rsqrt(var + eps)


def _prelu(v, alpha):
    return jnp.where(v >= 0, v, v * alpha)


# ---------------------------------------------------------------------------
# Pallas kernels
# ---------------------------------------------------------------------------

def _stats_kernel(x_ref, sum_ref, ssq_ref):
    # Per-sample channel sums for BatchNorm batch statistics.
    x = x_ref[0].astype(jnp.float32)                       # (H, W, C)
    sum_ref[...] = jnp.sum(x, axis=(0, 1), keepdims=True)  # (1, 1, C)
    ssq_ref[...] = jnp.sum(x * x, axis=(0, 1), keepdims=True)


def _up_conv1_kernel(z_ref, m0_ref, i0_ref, w1_ref, wsc_ref,
                     y1_ref, s_ref, y1s_ref, y1q_ref, ss_ref, sq_ref,
                     xpad_ref, *, scale1, scale_sc):
    _, H, W, IC = z_ref.shape
    OC = w1_ref.shape[-1]
    z = z_ref[0].astype(jnp.float32)                       # (H, W, IC)
    # Shortcut branch: EqConv2d(ic, oc, 1, 1, 0) on the *raw* input.
    s = jnp.dot(z.reshape(H * W, IC), wsc_ref[...],
                preferred_element_type=jnp.float32) * scale_sc
    s_ref[...] = s.reshape(1, H, W, OC).astype(s_ref.dtype)
    ss_ref[...] = jnp.sum(s, axis=0, keepdims=True).reshape(1, 1, OC)
    sq_ref[...] = jnp.sum(s * s, axis=0, keepdims=True).reshape(1, 1, OC)
    # Main branch: BatchNorm (precomputed batch stats) -> EqConv3x3.
    zn = (z - m0_ref[0]) * i0_ref[0]
    y1 = _conv3x3(zn, xpad_ref, w1_ref, scale1)            # (H*W, OC)
    y1_ref[...] = y1.reshape(1, H, W, OC).astype(y1_ref.dtype)
    y1s_ref[...] = jnp.sum(y1, axis=0, keepdims=True).reshape(1, 1, OC)
    y1q_ref[...] = jnp.sum(y1 * y1, axis=0, keepdims=True).reshape(1, 1, OC)


def _up_conv2_kernel(y1_ref, m1_ref, i1_ref, alpha_ref, w2_ref,
                     y2_ref, y2s_ref, y2q_ref, xpad_ref, *, scale2):
    _, H, W, OC = y1_ref.shape
    y1 = y1_ref[0].astype(jnp.float32)
    a = _prelu((y1 - m1_ref[0]) * i1_ref[0], alpha_ref[0])  # BN -> PReLU
    y2 = _conv3x3(a, xpad_ref, w2_ref, scale2)
    y2_ref[...] = y2.reshape(1, H, W, OC).astype(y2_ref.dtype)
    y2s_ref[...] = jnp.sum(y2, axis=0, keepdims=True).reshape(1, 1, OC)
    y2q_ref[...] = jnp.sum(y2 * y2, axis=0, keepdims=True).reshape(1, 1, OC)


def _up_final_kernel(y2_ref, m2_ref, i2_ref, s_ref, ms_ref, is_ref, o_ref):
    # BN(main) + BN(shortcut) + residual add, fused.
    y2 = y2_ref[...].astype(jnp.float32)
    s = s_ref[...].astype(jnp.float32)
    o = (y2 - m2_ref[0]) * i2_ref[0] + (s - ms_ref[0]) * is_ref[0]
    o_ref[...] = o.astype(o_ref.dtype)


def _down_conv1_kernel(x_ref, alpha_ref, w1_ref, a1_ref, xpad_ref, *, scale1):
    _, H, W, IC = x_ref.shape
    OC = w1_ref.shape[-1]
    x = x_ref[0].astype(jnp.float32)
    xn = _normalize(x, (0, 1))                        # GroupNorm(ic, ic)
    y = _conv3x3(xn, xpad_ref, w1_ref, scale1)        # (H*W, OC)
    a1 = _prelu(_normalize(y, 0), alpha_ref[0])       # GroupNorm(oc, oc) -> PReLU
    a1_ref[...] = a1.reshape(1, H, W, OC).astype(a1_ref.dtype)


def _down_conv2_kernel(a1_ref, w2_ref, o_ref, xpad_ref, *, scale2):
    _, H, W, OC = a1_ref.shape
    a1 = a1_ref[0].astype(jnp.float32)
    y = _conv3x3(a1, xpad_ref, w2_ref, scale2)
    yn = _normalize(y, 0).reshape(H, W, OC)           # GroupNorm(oc, oc)
    # H-direction half of the 2x2 average pool (row pairs -> mean).
    yh = 0.5 * jnp.sum(yn.reshape(H // 2, 2, W, OC), axis=1)
    o_ref[...] = yh.reshape(1, H // 2, W, OC).astype(o_ref.dtype)


def _pool_w_kernel(x_ref, o_ref):
    # x block: (1, Ho, Wo, 2, C) -- average the adjacent-column pairs.
    x = x_ref[...].astype(jnp.float32)
    o_ref[...] = (0.5 * jnp.sum(x, axis=3)).astype(o_ref.dtype)


# ---------------------------------------------------------------------------
# Spec helpers & wrappers
# ---------------------------------------------------------------------------

def _sample_spec(shape):
    nd = len(shape)
    return pl.BlockSpec((1,) + tuple(shape[1:]),
                        lambda n, nd=nd: (n,) + (0,) * (nd - 1))


def _bcast_spec(shape):
    nd = len(shape)
    return pl.BlockSpec(tuple(shape), lambda n, nd=nd: (0,) * nd)


def _batch_stats(sums, ssqs, count, eps=_EPS):
    # Combine per-sample partial sums into BatchNorm batch statistics (tiny arrays).
    s = jnp.sum(sums, axis=0)                         # (1, C)
    q = jnp.sum(ssqs, axis=0)
    mean = s / count
    var = q / count - mean * mean
    return mean[None], lax.rsqrt(var + eps)[None]     # each (1, 1, C)


def resblk_forward(x_nchw, params, up):
    # NCHW in/out (PyTorch convention); compute in NHWC (channels on lanes).
    x = jnp.transpose(x_nchw, (0, 2, 3, 1)).astype(jnp.float32)
    N, H, W, IC = x.shape
    OC = params["w1"].shape[0]
    w1 = jnp.transpose(params["w1"], (2, 3, 1, 0)).reshape(9, IC, OC)
    w2 = jnp.transpose(params["w2"], (2, 3, 1, 0)).reshape(9, OC, OC)
    alpha = params["alpha"].reshape(1, 1, OC).astype(jnp.float32)
    scale1 = float(params["scale1"])
    scale2 = float(params["scale2"])
    cp = pltpu.CompilerParams(dimension_semantics=("parallel",))
    f32 = jnp.float32

    if up:
        # ---- BatchNorm path (training-mode batch statistics) ------------------
        wsc = params["w_sc"].reshape(OC, IC).T                     # (IC, OC)
        # BatchNorm stats of Upscale2d(x) == stats of x (replication-invariant).
        xs, xq = pl.pallas_call(
            _stats_kernel,
            grid=(N,),
            in_specs=[_sample_spec((N, H, W, IC))],
            out_specs=(_sample_spec((N, 1, IC)), _sample_spec((N, 1, IC))),
            out_shape=(jax.ShapeDtypeStruct((N, 1, IC), f32),
                       jax.ShapeDtypeStruct((N, 1, IC), f32)),
            compiler_params=cp)(x)
        m0, i0 = _batch_stats(xs, xq, N * H * W)

        # TODO(synk): the 2x nearest-neighbour upsample is still XLA glue; folding
        # it into the conv kernels' reads would save one 4x-sized HBM round trip.
        z = jnp.repeat(jnp.repeat(x, 2, axis=1), 2, axis=2)
        Hu, Wu = 2 * H, 2 * W

        # Fused: BN-normalize + EqConv3x3 (main)  AND  EqConv1x1 (shortcut),
        # plus per-sample channel sums for the following BatchNorms.
        y1, s, y1s, y1q, ss, sq = pl.pallas_call(
            functools.partial(_up_conv1_kernel, scale1=scale1,
                              scale_sc=float(params["scale_sc"])),
            grid=(N,),
            in_specs=[_sample_spec((N, Hu, Wu, IC)), _bcast_spec((1, 1, IC)),
                      _bcast_spec((1, 1, IC)), _bcast_spec((9, IC, OC)),
                      _bcast_spec((IC, OC))],
            out_specs=(_sample_spec((N, Hu, Wu, OC)), _sample_spec((N, Hu, Wu, OC)),
                       _sample_spec((N, 1, OC)), _sample_spec((N, 1, OC)),
                       _sample_spec((N, 1, OC)), _sample_spec((N, 1, OC))),
            out_shape=(jax.ShapeDtypeStruct((N, Hu, Wu, OC), f32),
                       jax.ShapeDtypeStruct((N, Hu, Wu, OC), f32),
                       jax.ShapeDtypeStruct((N, 1, OC), f32),
                       jax.ShapeDtypeStruct((N, 1, OC), f32),
                       jax.ShapeDtypeStruct((N, 1, OC), f32),
                       jax.ShapeDtypeStruct((N, 1, OC), f32)),
            scratch_shapes=[pltpu.VMEM((Hu + 2, Wu + 2, IC), f32)],
            compiler_params=cp)(z, m0, i0, w1, wsc)
        m1, i1 = _batch_stats(y1s, y1q, N * Hu * Wu)
        msc, isc = _batch_stats(ss, sq, N * Hu * Wu)

        # Fused: BN-normalize + PReLU + EqConv3x3 (+ channel sums for the last BN).
        y2, y2s, y2q = pl.pallas_call(
            functools.partial(_up_conv2_kernel, scale2=scale2),
            grid=(N,),
            in_specs=[_sample_spec((N, Hu, Wu, OC)), _bcast_spec((1, 1, OC)),
                      _bcast_spec((1, 1, OC)), _bcast_spec((1, 1, OC)),
                      _bcast_spec((9, OC, OC))],
            out_specs=(_sample_spec((N, Hu, Wu, OC)),
                       _sample_spec((N, 1, OC)), _sample_spec((N, 1, OC))),
            out_shape=(jax.ShapeDtypeStruct((N, Hu, Wu, OC), f32),
                       jax.ShapeDtypeStruct((N, 1, OC), f32),
                       jax.ShapeDtypeStruct((N, 1, OC), f32)),
            scratch_shapes=[pltpu.VMEM((Hu + 2, Wu + 2, OC), f32)],
            compiler_params=cp)(y1, m1, i1, alpha, w2)
        m2, i2 = _batch_stats(y2s, y2q, N * Hu * Wu)

        # Fused: BN(main) + BN(shortcut) + residual add.
        out = pl.pallas_call(
            _up_final_kernel,
            grid=(N,),
            in_specs=[_sample_spec((N, Hu, Wu, OC)), _bcast_spec((1, 1, OC)),
                      _bcast_spec((1, 1, OC)), _sample_spec((N, Hu, Wu, OC)),
                      _bcast_spec((1, 1, OC)), _bcast_spec((1, 1, OC))],
            out_specs=_sample_spec((N, Hu, Wu, OC)),
            out_shape=jax.ShapeDtypeStruct((N, Hu, Wu, OC), f32),
            compiler_params=cp)(y2, m2, i2, s, msc, isc)
    else:
        # ---- GroupNorm(C, C) path: all statistics are per-sample -> fully fused.
        # (The shortcut branch is dead code when up=False, exactly as the reference.)
        a1 = pl.pallas_call(
            functools.partial(_down_conv1_kernel, scale1=scale1),
            grid=(N,),
            in_specs=[_sample_spec((N, H, W, IC)), _bcast_spec((1, 1, OC)),
                      _bcast_spec((9, IC, OC))],
            out_specs=_sample_spec((N, H, W, OC)),
            out_shape=jax.ShapeDtypeStruct((N, H, W, OC), f32),
            scratch_shapes=[pltpu.VMEM((H + 2, W + 2, IC), f32)],
            compiler_params=cp)(x, alpha, w1)

        yh = pl.pallas_call(
            functools.partial(_down_conv2_kernel, scale2=scale2),
            grid=(N,),
            in_specs=[_sample_spec((N, H, W, OC)), _bcast_spec((9, OC, OC))],
            out_specs=_sample_spec((N, H // 2, W, OC)),
            out_shape=jax.ShapeDtypeStruct((N, H // 2, W, OC), f32),
            scratch_shapes=[pltpu.VMEM((H + 2, W + 2, OC), f32)],
            compiler_params=cp)(a1, w2)

        # Row-major view (no data movement): pair adjacent columns for the W pool.
        yhv = yh.reshape(N, H // 2, W // 2, 2, OC)
        out = pl.pallas_call(
            _pool_w_kernel,
            grid=(N,),
            in_specs=[_sample_spec((N, H // 2, W // 2, 2, OC))],
            out_specs=_sample_spec((N, H // 2, W // 2, OC)),
            out_shape=jax.ShapeDtypeStruct((N, H // 2, W // 2, OC), f32),
            compiler_params=cp)(yhv)

    return jnp.transpose(out, (0, 3, 1, 2))


# ---------------------------------------------------------------------------
# Parameters
# ---------------------------------------------------------------------------

def eqconv_scale(ic, oc, k):
    # nn.init.calculate_gain('conv2d') == 1.0
    return ((ic + oc) * k * k / 2.0) ** (-0.5)


def init_resblk_params(key, ic, oc):
    k1, k2, k3 = jax.random.split(key, 3)
    return {
        "w1": jax.random.normal(k1, (oc, ic, 3, 3), jnp.float32),
        "scale1": eqconv_scale(ic, oc, 3),
        "w2": jax.random.normal(k2, (oc, oc, 3, 3), jnp.float32),
        "scale2": eqconv_scale(oc, oc, 3),
        "w_sc": jax.random.normal(k3, (oc, ic, 1, 1), jnp.float32),
        "scale_sc": eqconv_scale(ic, oc, 1),
        "alpha": jnp.full((oc,), 0.25, jnp.float32),  # PReLU default init
        # BatchNorm / GroupNorm affine params keep default init (1, 0) -> identity.
    }


# ---------------------------------------------------------------------------
# Pure-JAX reference (mirrors the PyTorch forward) for a sanity check
# ---------------------------------------------------------------------------

def resblk_reference(x_nchw, params, up):
    def eqconv(x, w, s, pad):
        y = lax.conv_general_dilated(
            x, w, window_strides=(1, 1), padding=[(pad, pad), (pad, pad)],
            dimension_numbers=("NCHW", "OIHW", "NCHW"),
            precision=lax.Precision.HIGHEST)
        return y * s

    def bnorm(x):
        m = jnp.mean(x, axis=(0, 2, 3), keepdims=True)
        v = jnp.mean(jnp.square(x - m), axis=(0, 2, 3), keepdims=True)
        return (x - m) / jnp.sqrt(v + 1e-5)

    def gnorm(x):
        m = jnp.mean(x, axis=(2, 3), keepdims=True)
        v = jnp.mean(jnp.square(x - m), axis=(2, 3), keepdims=True)
        return (x - m) / jnp.sqrt(v + 1e-5)

    norm = bnorm if up else gnorm
    z = x_nchw
    if up:
        z = jnp.repeat(jnp.repeat(z, 2, axis=2), 2, axis=3)
    z_sc = norm(eqconv(z, params["w_sc"], params["scale_sc"], 0))
    y = norm(z)
    y = eqconv(y, params["w1"], params["scale1"], 1)
    y = norm(y)
    a = params["alpha"].reshape(1, -1, 1, 1)
    y = jnp.where(y >= 0, y, y * a)
    y = eqconv(y, params["w2"], params["scale2"], 1)
    y = norm(y)
    if up:
        return z_sc + y
    N, C, Hh, Ww = y.shape
    return jnp.mean(y.reshape(N, C, Hh // 2, 2, Ww // 2, 2), axis=(3, 5))


# TODO(synk): BatchNorm2d running_mean/running_var buffer updates (a training-time
# side effect) are not materialized; normalization uses batch statistics exactly as
# PyTorch's train-mode forward does.

if __name__ == "__main__":
    key = jax.random.PRNGKey(0)
    kx, kp = jax.random.split(key)
    ic, oc = 4, 8
    N, H, W = 2, 16, 16
    x = jax.random.normal(kx, (N, ic, H, W), jnp.float32)
    params = init_resblk_params(kp, ic, oc)

    for up in (True, False):
        out = jax.block_until_ready(resblk_forward(x, params, up=up))
        ref = resblk_reference(x, params, up=up)
        assert out.shape == ref.shape, (out.shape, ref.shape)
        err = float(jnp.max(jnp.abs(out - ref)))
        assert err < 5e-2, err

    print("KERNEL_OK")
</pallas_src>

<mosaic_0001>
module attributes {stable_mosaic.version = 11 : i64} {
  func.func @_stats_kernel(%arg0: i32, %arg1: memref<1x16x16x4xf32, #tpu.memory_space<vmem>>, %arg2: memref<1x1x4xf32, #tpu.memory_space<vmem>>, %arg3: memref<1x1x4xf32, #tpu.memory_space<vmem>>) attributes {dimension_semantics = [#tpu.dimension_semantics<parallel>], iteration_bounds = array<i64: 2>, scalar_prefetch = 0 : i64, scratch_operands = 0 : i64, tpu.core_type = #tpu.core_type<tc>, window_params = [{transform_indices = @transform_0, window_bounds = array<i64: 1, 16, 16, 4>}, {transform_indices = @transform_1, window_bounds = array<i64: 1, 1, 4>}, {transform_indices = @transform_2, window_bounds = array<i64: 1, 1, 4>}]} {
    %c0 = arith.constant 0 : index
    %c0_0 = arith.constant 0 : index
    %c0_1 = arith.constant 0 : index
    %c0_2 = arith.constant 0 : index
    %0 = vector.load %arg1[%c0, %c0_0, %c0_1, %c0_2] : memref<1x16x16x4xf32, #tpu.memory_space<vmem>>, vector<1x16x16x4xf32>
    %1 = vector.shape_cast %0 : vector<1x16x16x4xf32> to vector<16x16x4xf32>
    %cst = arith.constant dense<0.000000e+00> : vector<4xf32>
    %2 = vector.multi_reduction <add>, %1, %cst [0, 1] : vector<16x16x4xf32> to vector<4xf32>
    %3 = vector.shape_cast %2 : vector<4xf32> to vector<1x1x4xf32>
    %c0_3 = arith.constant 0 : index
    %c0_4 = arith.constant 0 : index
    %c0_5 = arith.constant 0 : index
    %4 = vector.load %arg2[%c0_3, %c0_4, %c0_5] : memref<1x1x4xf32, #tpu.memory_space<vmem>>, vector<1x1x4xf32>
    tpu.vector_store %arg2[%c0_3, %c0_4, %c0_5], %3 {strides = array<i32>} : memref<1x1x4xf32, #tpu.memory_space<vmem>>, vector<1x1x4xf32>,
    %5 = arith.mulf %1, %1 : vector<16x16x4xf32>
    %cst_6 = arith.constant dense<0.000000e+00> : vector<4xf32>
    %6 = vector.multi_reduction <add>, %5, %cst_6 [0, 1] : vector<16x16x4xf32> to vector<4xf32>
    %7 = vector.shape_cast %6 : vector<4xf32> to vector<1x1x4xf32>
    %c0_7 = arith.constant 0 : index
    %c0_8 = arith.constant 0 : index
    %c0_9 = arith.constant 0 : index
    %8 = vector.load %arg3[%c0_7, %c0_8, %c0_9] : memref<1x1x4xf32, #tpu.memory_space<vmem>>, vector<1x1x4xf32>
    tpu.vector_store %arg3[%c0_7, %c0_8, %c0_9], %7 {strides = array<i32>} : memref<1x1x4xf32, #tpu.memory_space<vmem>>, vector<1x1x4xf32>,
    return
  }
  func.func @transform_0(%arg0: i32) -> (i32, i32, i32, i32) {
    %c0_i32 = arith.constant 0 : i32
    %c0_i32_0 = arith.constant 0 : i32
    %c0_i32_1 = arith.constant 0 : i32
    %c0_i32_2 = arith.constant 0 : i32
    return %arg0, %c0_i32, %c0_i32_0, %c0_i32_1 : i32, i32, i32, i32
  }
  func.func @transform_1(%arg0: i32) -> (i32, i32, i32) {
    %c0_i32 = arith.constant 0 : i32
    %c0_i32_0 = arith.constant 0 : i32
    %c0_i32_1 = arith.constant 0 : i32
    return %arg0, %c0_i32, %c0_i32_0 : i32, i32, i32
  }
  func.func @transform_2(%arg0: i32) -> (i32, i32, i32) {
    %c0_i32 = arith.constant 0 : i32
    %c0_i32_0 = arith.constant 0 : i32
    %c0_i32_1 = arith.constant 0 : i32
    return %arg0, %c0_i32, %c0_i32_0 : i32, i32, i32
  }
}

</mosaic_0001>

<bundles_post_ra>
// kernel: tpu_custom_call.1
= control target key start
LH: loop header
LB: loop body
LE: loop exit
PB: predicated region body
PF: predicated region fallthrough
CT: control target
= control target key end

     0   :  { %8 = vsyncpa [#allocation3], 0  ;;  %s876_s0 = inlined_call_operand.vmem [shape: f32[2,16,16,4], index: 0, kind: input, shape index: {}]   ;;  %s877_s1 = inlined_call_operand.hbm [shape: f32[2,1,4], index: 1, kind: output, shape index: {0}]   ;;  %s878_s2 = inlined_call_operand.hbm [shape: f32[2,1,4], index: 2, kind: output, shape index: {1}]  }
   0x1   :  { %10 = vsyncpa [#allocation3 + $0x1], 0 }
   0x2   :  { %11 = vsyncpa [#allocation5], 0 }
   0x3   :  { %13 = vsyncpa [#allocation5 + $0x1], 0  ;;  %s638_s9 = smov 0   ;;  %s640_s10 = smov 0  }
   0x4   :  { %s642_s11 = smov 0   ;;  %s644_s12 = smov 0  }
   0x5 LB: > { %s659_s13 = sadd.s32 4294967295, %s619_s12   ;;  %s470_s14 = sadd.s32 4294967294, %s619_s12   ;;  %s619_s12 = sphi %s644_s12, %s884_s12   ;;  %s615_s11 = sphi %s642_s11, %s883_s11   ;;  %s611_s10 = sphi %s640_s10, %s882_s10   ;;  %s607_s9 = sphi %s638_s9, %s881_s9  }
   0x6   : > { %s663_s15 = sadd.s32 1, %s619_s12   ;;  %s52_s16 = sadd.s32 1, %s615_s11 }
   0x7   : > { %s49_s17 = ssub.s32 %s619_s12, %s663_s15  ;;  %p62_p0 = scmp.ne.s32.totalorder %s615_s11, %s611_s10 }
   0x8   : > { %p50_p1 = scmp.eq.s32.totalorder %s49_s17, 0  ;;  %p63_p2 = scmp.eq.s32.totalorder %s659_s13, 1 }
   0x9   : > { %p68_p3 = scmp.ne.s32.totalorder %s611_s10, %s607_s9  ;;  %p69_p4 = scmp.eq.s32.totalorder %s470_s14, 1 }
   0xa   : > { %s674_s18 = scalar_select %p50_p1, %s615_s11, %s52_s16  }
   0xb   : > { %p676_p5 = por %p63_p2, %p62_p0  ;;  %p680_p6 = por %p69_p4, %p68_p3 }
   0xc   : > { %p473_p7 = scmp.ge.s32.totalorder %s619_s12, 1  ;;  %p121_p8 = scmp.lt.s32.totalorder %s619_s12, 3 }
   0xe   : > { %p122_p9 = pnand %p473_p7, %p121_p8 }
   0xf   : > { %p146_p10 = scmp.lt.s32.totalorder (!%p122_p9), %s659_s13, 1  ;;  %vm183_vm0 = vcmask (!%p122_p9), 31744   ;;  %s783_s26 = sand.u32 (!%p122_p9), 1, %s611_s10   ;;  %vm253_vm1 = vcmask (!%p122_p9), 24576  }
  0x10   : > { %125 = sbr.rel (%p122_p9) target bundleno = 146 (0x92), region = 24  ;;  %s139_s27 = scalar_lea.vmem (!%p122_p9), [#allocation2], %s783_s26 }
  0x11   : > { %s374_s28 = sshll.u32 (!%p122_p9), %s139_s27, 4  ;;  %s476_s29 = sshll.u32 (!%p122_p9), %s659_s13, 4  ;;  %s791_s28 = int_to_ptr.vmem [resolvable:$true] %s374_s28 }
  0x12   : > { %s799_s4 = scalar_lea.hbm (!%p122_p9), %s877_s1, %s476_s29  ;;  %s358_s5 = scalar_lea.sflag (!%p122_p9), [#allocation3], %s783_s26 }
  0x13   : > { %s525_s6 = scalar_lea.vmem (!%p122_p9), %s791_s28, 16  ;;  %s621_s7 = smov (!%p122_p9), [#allocation2]  }
  0x14   : > { %p526_p11 = scmp.ne.s32.totalorder (!%p122_p9), %s791_s28, %s525_s6  ;;  %s529_s8 = sshll.u32 (!%p122_p9), %s621_s7, 4  ;;  %s530_s8 = int_to_ptr.vmem [resolvable:$false] %s529_s8 }
  0x15   : > { %s531_s14 = scalar_lea.vmem (!%p122_p9), %s530_s8, 32  ;;  %p532_p0 = scmp.lt.s32.totalorder (!%p122_p9), %s791_s28, %s530_s8 }
  0x16   : > { %p527_p12 = pnand (!%p122_p9), %p526_p11, %p676_p5  ;;  %p533_p1 = scmp.lt.s32.totalorder (!%p122_p9), %s531_s14, %s525_s6 }
  0x17   : > { %s147_s21 = scalar_select %p146_p10, %s659_s13, 1 }
  0x18   : > { %p528_p13 = pneg %p527_p12  ;;  %p534_p2 = por %p533_p1, %p532_p0 }
  0x19   : > { %s480_s22 = sshll.u32 %s147_s21, 8 }
  0x1a   : > { %s691_s25 = scalar_lea.vmem %s876_s0, %s480_s22  ;;  %p535_p3 = pnand %p534_p2, %p528_p13 }
  0x1b   : > { %v151_v0 = vld [vmem:[%s691_s25] sm:$0xff]  ;;  %v152_v1 = vld [vmem:[%s691_s25 + $0x8] sm:$0xff]  ;;  %v153_v2 = vld [vmem:[%s691_s25 + $0x10] sm:$0xff] }
  0x1c   : > { %v184_v3 = vsel %vm183_vm0, %v151_v0, 0.0  ;;  %v185_v4 = vsel %vm183_vm0, %v152_v1, 0.0  ;;  %v187_v5 = vsel %vm183_vm0, %v153_v2, 0.0  ;;  %v154_v6 = vld [vmem:[%s691_s25 + $0x18] sm:$0xff]  ;;  %v155_v9 = vld [vmem:[%s691_s25 + $0x20] sm:$0xff]  ;;  %v156_v12 = vld [vmem:[%s691_s25 + $0x28] sm:$0xff]  ;;  %v255_v27 = vmul.f32 %v151_v0, %v151_v0 }
  0x1d   : > { %v186_v7 = vadd.f32 %v185_v4, %v184_v3  ;;  %v189_v8 = vsel %vm183_vm0, %v154_v6, 0.0  ;;  %v191_v11 = vsel %vm183_vm0, %v155_v9, 0.0  ;;  %v193_v14 = vsel %vm183_vm0, %v156_v12, 0.0  ;;  %v157_v15 = vld [vmem:[%s691_s25 + $0x30] sm:$0xff]  ;;  %v158_v18 = vld [vmem:[%s691_s25 + $0x38] sm:$0xff]  ;;  %v159_v21 = vld [vmem:[%s691_s25 + $0x40] sm:$0xff] }
  0x1e   : > { %v195_v17 = vsel %vm183_vm0, %v157_v15, 0.0  ;;  %v197_v20 = vsel %vm183_vm0, %v158_v18, 0.0  ;;  %v199_v23 = vsel %vm183_vm0, %v159_v21, 0.0  ;;  %v160_v24 = vld [vmem:[%s691_s25 + $0x48] sm:$0xff]  ;;  %v256_v28 = vmul.f32 %v152_v1, %v152_v1  ;;  %v161_v30 = vld [vmem:[%s691_s25 + $0x50] sm:$0xff]  ;;  %v162_v32 = vld [vmem:[%s691_s25 + $0x58] sm:$0xff] }
  0x1f   : > { %v188_v10 = vadd.f32 %v187_v5, %v186_v7  ;;  %v201_v26 = vsel %vm183_vm0, %v160_v24, 0.0  ;;  %v257_v29 = vmul.f32 %v153_v2, %v153_v2  ;;  %v203_v33 = vsel %vm183_vm0, %v161_v30, 0.0  ;;  %v163_v41 = vld [vmem:[%s691_s25 + $0x60] sm:$0xff]  ;;  %v164_v47 = vld [vmem:[%s691_s25 + $0x68] sm:$0xff]  ;;  %v165_v53 = vld [vmem:[%s691_s25 + $0x70] sm:$0xff] }
  0x20   : > { %v258_v34 = vmul.f32 %v154_v6, %v154_v6  ;;  %v205_v36 = vsel %vm183_vm0, %v162_v32, 0.0  ;;  %v259_v37 = vmul.f32 %v155_v9, %v155_v9  ;;  %v287_v38 = vsel %vm183_vm0, %v255_v27, 0.0  ;;  %v166_v59 = vld [vmem:[%s691_s25 + $0x78] sm:$0xff]  ;;  %v167_v1 = vld [vmem:[%s691_s25 + $0x80] sm:$0xff]  ;;  %v168_v7 = vld [vmem:[%s691_s25 + $0x88] sm:$0xff] }
  0x21   : > { %v190_v13 = vadd.f32 %v189_v8, %v188_v10  ;;  %v288_v39 = vsel %vm183_vm0, %v256_v28, 0.0  ;;  %v290_v40 = vsel %vm183_vm0, %v257_v29, 0.0  ;;  %v207_v44 = vsel %vm183_vm0, %v163_v41, 0.0 }
  0x22   : > { %v289_v43 = vadd.f32 %v288_v39, %v287_v38  ;;  %v260_v45 = vmul.f32 %v156_v12, %v156_v12  ;;  %v292_v46 = vsel %vm183_vm0, %v258_v34, 0.0  ;;  %v209_v50 = vsel %vm183_vm0, %v164_v47, 0.0 }
  0x23   : > { %v192_v16 = vadd.f32 %v191_v11, %v190_v13  ;;  %v261_v51 = vmul.f32 %v157_v15, %v157_v15  ;;  %v294_v52 = vsel %vm183_vm0, %v259_v37, 0.0  ;;  %v211_v56 = vsel %vm183_vm0, %v165_v53, 0.0  ;;  %v169_v13 = vld [vmem:[%s691_s25 + $0x90] sm:$0xff] }
  0x24   : > { %v291_v49 = vadd.f32 %v290_v40, %v289_v43  ;;  %v262_v57 = vmul.f32 %v158_v18, %v158_v18  ;;  %v296_v58 = vsel %vm183_vm0, %v260_v45, 0.0  ;;  %v213_v62 = vsel %vm183_vm0, %v166_v59, 0.0  ;;  %v173_v37 = vld [vmem:[%s691_s25 + $0xb0] sm:$0xff]  ;;  %v174_v43 = vld [vmem:[%s691_s25 + $0xb8] sm:$0xff] }
  0x25   : > { %v194_v19 = vadd.f32 %v193_v14, %v192_v16  ;;  %v263_v63 = vmul.f32 %v159_v21, %v159_v21  ;;  %v298_v0 = vsel %vm183_vm0, %v261_v51, 0.0  ;;  %v215_v4 = vsel %vm183_vm0, %v167_v1, 0.0 }
  0x26   : > { %v293_v55 = vadd.f32 %v292_v46, %v291_v49  ;;  %v264_v5 = vmul.f32 %v160_v24, %v160_v24  ;;  %v300_v6 = vsel %vm183_vm0, %v262_v57, 0.0  ;;  %v217_v10 = vsel %vm183_vm0, %v168_v7, 0.0  ;;  %v175_v49 = vld [vmem:[%s691_s25 + $0xc0] sm:$0xff] }
  0x27   : > { %v196_v22 = vadd.f32 %v195_v17, %v194_v19  ;;  %v265_v11 = vmul.f32 %v161_v30, %v161_v30  ;;  %v302_v12 = vsel %vm183_vm0, %v263_v63, 0.0  ;;  %v219_v16 = vsel %vm183_vm0, %v169_v13, 0.0  ;;  %v170_v19 = vld [vmem:[%s691_s25 + $0x98] sm:$0xff] }
  0x28   : > { %v295_v61 = vadd.f32 %v294_v52, %v293_v55  ;;  %v266_v17 = vmul.f32 %v162_v32, %v162_v32  ;;  %v304_v18 = vsel %vm183_vm0, %v264_v5, 0.0  ;;  %v268_v29 = vmul.f32 %v164_v47, %v164_v47  ;;  %v176_v55 = vld [vmem:[%s691_s25 + $0xc8] sm:$0xff] }
  0x29   : > { %v198_v25 = vadd.f32 %v197_v20, %v196_v22  ;;  %v221_v22 = vsel %vm183_vm0, %v170_v19, 0.0  ;;  %v306_v24 = vsel %vm183_vm0, %v265_v11, 0.0  ;;  %v227_v40 = vsel %vm183_vm0, %v173_v37, 0.0 }
  0x2a   : > { %v297_v3 = vadd.f32 %v296_v58, %v295_v61  ;;  %v308_v30 = vsel %vm183_vm0, %v266_v17, 0.0  ;;  %v229_v46 = vsel %vm183_vm0, %v174_v43, 0.0  ;;  %v271_v47 = vmul.f32 %v167_v1, %v167_v1  ;;  %v177_v61 = vld [vmem:[%s691_s25 + $0xd0] sm:$0xff] }
  0x2b   : > { %v200_v31 = vadd.f32 %v199_v23, %v198_v25  ;;  %v267_v23 = vmul.f32 %v163_v41, %v163_v41  ;;  %v171_v25 = vld [vmem:[%s691_s25 + $0xa0] sm:$0xff]  ;;  %v270_v41 = vmul.f32 %v166_v59, %v166_v59  ;;  %v231_v52 = vsel %vm183_vm0, %v175_v49, 0.0 }
  0x2c   : > { %v299_v9 = vadd.f32 %v298_v0, %v297_v3  ;;  %v223_v28 = vsel %vm183_vm0, %v171_v25, 0.0  ;;  %v233_v58 = vsel %vm183_vm0, %v176_v55, 0.0  ;;  %v273_v59 = vmul.f32 %v169_v13, %v169_v13  ;;  %v178_v3 = vld [vmem:[%s691_s25 + $0xd8] sm:$0xff] }
  0x2d   : > { %v202_v35 = vadd.f32 %v201_v26, %v200_v31  ;;  %v172_v31 = vld [vmem:[%s691_s25 + $0xa8] sm:$0xff]  ;;  %v235_v0 = vsel %vm183_vm0, %v177_v61, 0.0  ;;  %v274_v1 = vmul.f32 %v170_v19, %v170_v19  ;;  %v277_v19 = vmul.f32 %v173_v37, %v173_v37 }
  0x2e   : > { %v301_v15 = vadd.f32 %v300_v6, %v299_v9  ;;  %v225_v34 = vsel %vm183_vm0, %v172_v31, 0.0  ;;  %v237_v6 = vsel %vm183_vm0, %v178_v3, 0.0  ;;  %v179_v9 = vld [vmem:[%s691_s25 + $0xe0] sm:$0xff]  ;;  %v276_v13 = vmul.f32 %v172_v31, %v172_v31 }
  0x2f   : > { %v204_v42 = vadd.f32 %v203_v33, %v202_v35  ;;  %v269_v35 = vmul.f32 %v165_v53, %v165_v53  ;;  %v272_v53 = vmul.f32 %v168_v7, %v168_v7  ;;  %v275_v7 = vmul.f32 %v171_v25, %v171_v25 }
  0x30   : > { %v303_v21 = vadd.f32 %v302_v12, %v301_v15  ;;  %v239_v12 = vsel %vm183_vm0, %v179_v9, 0.0  ;;  %v180_v15 = vld [vmem:[%s691_s25 + $0xe8] sm:$0xff]  ;;  %v278_v25 = vmul.f32 %v174_v43, %v174_v43  ;;  %v279_v31 = vmul.f32 %v175_v49, %v175_v49 }
  0x31   : > { %v206_v48 = vadd.f32 %v205_v36, %v204_v42  ;;  %v310_v36 = vsel %vm183_vm0, %v267_v23, 0.0  ;;  %v312_v42 = vsel %vm183_vm0, %v268_v29, 0.0  ;;  %v282_v43 = vmul.f32 %v178_v3, %v178_v3 }
  0x32   : > { %v305_v27 = vadd.f32 %v304_v18, %v303_v21  ;;  %v241_v18 = vsel %vm183_vm0, %v180_v15, 0.0  ;;  %v181_v21 = vld [vmem:[%s691_s25 + $0xf0] sm:$0xff] }
  0x33   : > { %v208_v54 = vadd.f32 %v207_v44, %v206_v48  ;;  %v314_v48 = vsel %vm183_vm0, %v269_v35, 0.0  ;;  %v280_v35 = vmul.f32 %v176_v55, %v176_v55  ;;  %v285_v55 = vmul.f32 %v181_v21, %v181_v21 }
  0x34   : > { %v307_v33 = vadd.f32 %v306_v24, %v305_v27  ;;  %v243_v24 = vsel %vm183_vm0, %v181_v21, 0.0  ;;  %v182_v27 = vld [vmem:[%s691_s25 + $0xf8] sm:$0xff] }
  0x35   : > { %v210_v60 = vadd.f32 %v209_v50, %v208_v54  ;;  %v316_v54 = vsel %vm183_vm0, %v270_v41, 0.0 }
  0x36   : > { %v309_v39 = vadd.f32 %v308_v30, %v307_v33  ;;  %v245_v30 = vsel %vm183_vm0, %v182_v27, 0.0 }
  0x37   : > { %v212_v2 = vadd.f32 %v211_v56, %v210_v60  ;;  %v318_v60 = vsel %vm183_vm0, %v271_v47, 0.0  ;;  %v283_v47 = vmul.f32 %v179_v9, %v179_v9 }
  0x38   : > { %v311_v45 = vadd.f32 %v310_v36, %v309_v39  ;;  %v332_v36 = vsel %vm183_vm0, %v278_v25, 0.0  ;;  %v281_v39 = vmul.f32 %v177_v61, %v177_v61 }
  0x39   : > { %v214_v8 = vadd.f32 %v213_v62, %v212_v2  ;;  %v320_v2 = vsel %vm183_vm0, %v272_v53, 0.0 }
  0x3a   : > { %v313_v51 = vadd.f32 %v312_v42, %v311_v45 }
  0x3b   : > { %v216_v14 = vadd.f32 %v215_v4, %v214_v8  ;;  %v322_v8 = vsel %vm183_vm0, %v273_v59, 0.0  ;;  %v286_v59 = vmul.f32 %v182_v27, %v182_v27 }
  0x3c   : > { %v315_v57 = vadd.f32 %v314_v48, %v313_v51  ;;  %v338_v48 = vsel %vm183_vm0, %v281_v39, 0.0  ;;  %v284_v51 = vmul.f32 %v180_v15, %v180_v15 }
  0x3d   : > { %v218_v20 = vadd.f32 %v217_v10, %v216_v14  ;;  %v324_v14 = vsel %vm183_vm0, %v274_v1, 0.0  ;;  %v348_v1 = vsel %vm183_vm0, %v286_v59, 0.0 }
  0x3e   : > { %v317_v63 = vadd.f32 %v316_v54, %v315_v57 }
  0x3f   : > { %v220_v26 = vadd.f32 %v219_v16, %v218_v20  ;;  %v326_v20 = vsel %vm183_vm0, %v275_v7, 0.0 }
  0x40   : > { %v319_v5 = vadd.f32 %v318_v60, %v317_v63  ;;  %v344_v60 = vsel %vm183_vm0, %v284_v51, 0.0  ;;  %v346_v63 = vsel %vm183_vm0, %v285_v55, 0.0 }
  0x41   : > { %v222_v32 = vadd.f32 %v221_v22, %v220_v26  ;;  %v328_v26 = vsel %vm183_vm0, %v276_v13, 0.0 }
  0x42   : > { %v321_v11 = vadd.f32 %v320_v2, %v319_v5 }
  0x43   : > { %v224_v38 = vadd.f32 %v223_v28, %v222_v32  ;;  %v330_v32 = vsel %vm183_vm0, %v277_v19, 0.0 }
  0x44   : > { %v323_v17 = vadd.f32 %v322_v8, %v321_v11 }
  0x45   : > { %v226_v44 = vadd.f32 %v225_v34, %v224_v38 }
  0x46   : > { %v325_v23 = vadd.f32 %v324_v14, %v323_v17 }
  0x47   : > { %v228_v50 = vadd.f32 %v227_v40, %v226_v44  ;;  %v334_v40 = vsel %vm183_vm0, %v279_v31, 0.0  ;;  %v336_v44 = vsel %vm183_vm0, %v280_v35, 0.0 }
  0x48   : > { %v327_v29 = vadd.f32 %v326_v20, %v325_v23 }
  0x49   : > { %v230_v56 = vadd.f32 %v229_v46, %v228_v50 }
  0x4a   : > { %v329_v34 = vadd.f32 %v328_v26, %v327_v29 }
  0x4b   : > { %v232_v62 = vadd.f32 %v231_v52, %v230_v56  ;;  %v340_v52 = vsel %vm183_vm0, %v282_v43, 0.0  ;;  %v342_v56 = vsel %vm183_vm0, %v283_v47, 0.0 }
  0x4c   : > { %v331_v38 = vadd.f32 %v330_v32, %v329_v34 }
  0x4d   : > { %v234_v4 = vadd.f32 %v233_v58, %v232_v62 }
  0x4e   : > { %v333_v42 = vadd.f32 %v332_v36, %v331_v38 }
  0x4f   : > { %v236_v10 = vadd.f32 %v235_v0, %v234_v4 }
  0x50   : > { %v335_v46 = vadd.f32 %v334_v40, %v333_v42 }
  0x51   : > { %v238_v16 = vadd.f32 %v237_v6, %v236_v10 }
  0x52   : > { %v337_v50 = vadd.f32 %v336_v44, %v335_v46 }
  0x53   : > { %v240_v22 = vadd.f32 %v239_v12, %v238_v16 }
  0x54   : > { %v339_v54 = vadd.f32 %v338_v48, %v337_v50 }
  0x55   : > { %v242_v28 = vadd.f32 %v241_v18, %v240_v22 }
  0x56   : > { %v341_v58 = vadd.f32 %v340_v52, %v339_v54 }
  0x57   : > { %v244_v33 = vadd.f32 %v243_v24, %v242_v28 }
  0x58   : > { %v343_v62 = vadd.f32 %v342_v56, %v341_v58 }
  0x59   : > { %v246_v37 = vadd.f32 %v245_v30, %v244_v33 }
  0x5a   : > { %v345_v0 = vadd.f32 %v344_v60, %v343_v62 }
  0x5b   : > { %v247_v41 = vrot.slane %v246_v37, 4 }
  0x5d   : > { %v248_v45 = vadd.f32 %v247_v41, %v246_v37 }
  0x5f   : > { %v249_v49 = vrot.slane %v248_v45, 2 }
  0x61   : > { %v250_v53 = vadd.f32 %v249_v49, %v248_v45 }
  0x63   : > { %v251_v57 = vrot.slane %v250_v53, 1 }
  0x65   : > { %v252_v61 = vadd.f32 %v251_v57, %v250_v53 }
  0x67   : > { %254 = vst.msk [vmem:[%s139_s27] sm:$0x1] %vm253_vm1, %v252_v61 }
  0x68   : > { %538 = shalt.err (!%p535_p3)
}
  0x69   : > { %s539_s16 = scalar_lea.hbm %s799_s4, 16  ;;  %s543_s22 = scalar_lea.hbm %s877_s1, 32 }
  0x6a   : > { %p540_p4 = scmp.ne.s32.totalorder %s799_s4, %s539_s16  ;;  %p544_p9 = scmp.lt.u32.totalorder %s799_s4, %s877_s1 }
  0x6b   : > { %p545_p10 = scmp.lt.u32.totalorder %s543_s22, %s539_s16  ;;  %p547_p12 = scmp.lt.u32.totalorder %s539_s16, %s799_s4 }
  0x6c   : > { %p541_p7 = pnand %p540_p4, %p676_p5 }
  0x6d   : > { %p546_p11 = por %p545_p10, %p544_p9 }
  0x6e   : > { %p542_p8 = pneg %p541_p7 }
  0x6f   : > { %p548_p13 = por %p547_p12, %p546_p11 }
  0x71   : > { %p549_p0 = pnand %p548_p13, %p542_p8 }
  0x73   : > { %552 = shalt.err (!%p549_p0)
}
  0x74   : > { %481 = dma.vmem_to_hbm [thread:$0]  (%p676_p5), %s791_s28, 16, %s799_s4, %s358_s5   ;;  %v347_v2 = vadd.f32 %v346_v63, %v345_v0 }
  0x75   : > { %s145_s25 = scalar_lea.vmem [#allocation4], %s783_s26  ;;  %s834_s28 = scalar_lea.hbm %s878_s2, %s476_s29 }
  0x76   : > { %v349_v3 = vadd.f32 %v348_v1, %v347_v2  ;;  %s387_s27 = sshll.u32 %s145_s25, 4  ;;  %s362_s4 = scalar_lea.sflag [#allocation5], %s783_s26  ;;  %s827_s27 = int_to_ptr.vmem [resolvable:$true] %s387_s27 }
  0x77   : > { %s553_s5 = scalar_lea.vmem %s827_s27, 16  ;;  %s622_s6 = smov [#allocation4]  }
  0x78   : > { %v350_v4 = vrot.slane %v349_v3, 4  ;;  %p554_p1 = scmp.ne.s32.totalorder %s827_s27, %s553_s5  ;;  %s557_s7 = sshll.u32 %s622_s6, 4  ;;  %s558_s7 = int_to_ptr.vmem [resolvable:$false] %s557_s7 }
  0x79   : > { %s559_s8 = scalar_lea.vmem %s558_s7, 32  ;;  %p560_p4 = scmp.lt.s32.totalorder %s827_s27, %s558_s7 }
  0x7a   : > { %v351_v5 = vadd.f32 %v350_v4, %v349_v3  ;;  %p555_p2 = pnand %p554_p1, %p676_p5  ;;  %p561_p7 = scmp.lt.s32.totalorder %s559_s8, %s553_s5 }
  0x7c   : > { %v352_v6 = vrot.slane %v351_v5, 2  ;;  %p556_p3 = pneg %p555_p2  ;;  %p562_p8 = por %p561_p7, %p560_p4 }
  0x7e   : > { %v353_v7 = vadd.f32 %v352_v6, %v351_v5  ;;  %p563_p9 = pnand %p562_p8, %p556_p3 }
  0x80   : > { %v354_v8 = vrot.slane %v353_v7, 1 }
  0x82   : > { %v355_v9 = vadd.f32 %v354_v8, %v353_v7 }
  0x84   : > { %356 = vst.msk [vmem:[%s145_s25] sm:$0x1] %vm253_vm1, %v355_v9 }
  0x85   : > { %566 = shalt.err (!%p563_p9)
}
  0x86   : > { %s567_s13 = scalar_lea.hbm %s834_s28, 16  ;;  %s571_s14 = scalar_lea.hbm %s878_s2, 32 }
  0x87   : > { %p568_p10 = scmp.ne.s32.totalorder %s834_s28, %s567_s13  ;;  %p572_p13 = scmp.lt.u32.totalorder %s834_s28, %s878_s2 }
  0x88   : > { %p573_p0 = scmp.lt.u32.totalorder %s571_s14, %s567_s13  ;;  %p575_p2 = scmp.lt.u32.totalorder %s567_s13, %s834_s28 }
  0x89   : > { %p569_p11 = pnand %p568_p10, %p676_p5 }
  0x8a   : > { %p574_p1 = por %p573_p0, %p572_p13 }
  0x8b   : > { %p570_p12 = pneg %p569_p11 }
  0x8c   : > { %p576_p3 = por %p575_p2, %p574_p1 }
  0x8e   : > { %p577_p4 = pnand %p576_p3, %p570_p12 }
  0x90   : > { %580 = shalt.err (!%p577_p4)
}
  0x91   : > { %482 = dma.vmem_to_hbm [thread:$0]  (%p676_p5), %s827_s27, 16, %s834_s28, %s362_s4  }
  0x92 PF: > { %p492_p7 = scmp.ge.s32.totalorder %s619_s12, 2  ;;  %s399_s21 = sand.u32 1, %s607_s9  }
  0x93   : > { %s400_s22 = scalar_lea.sflag [#allocation3], %s399_s21 }
  0x94   : > { %p486_p8 = pnand %p492_p7, %p680_p6 }
  0x96   : > { %598 = dma.done.wait (!%p486_p8), %s400_s22, 16  }
  0x97   : > { %600 = vsyncadd (!%p486_p8), %s400_s22, 4294967280  ;;  %s408_s23 = scalar_lea.sflag [#allocation5], %s399_s21 }
  0x98   : > { %602 = dma.done.wait (!%p486_p8), %s408_s23, 16  }
  0x99   : > { %604 = vsyncadd (!%p486_p8), %s408_s23, 4294967280  ;;  %p16_p5 = scmp.ge.s32.totalorder %s663_s15, 4   ;;  %s881_s9 = smov %s611_s10 }
  0x9a   : > { %s882_s10 = smov %s615_s11  ;;  %s883_s11 = smov %s674_s18 }
  0x9b   : > { %s884_s12 = smov %s663_s15  ;;  %18 = sbr.rel (!%p16_p5) target bundleno = 5 (0x5), region = 76 }
  0xa2   :  { %412 = vsyncpa [#allocation3], 1 }
  0xa3   :  { %414 = vsyncpa [#allocation3 + $0x1], 1 }
  0xa4   :  { %415 = vsyncpa [#allocation5], 1 }
  0xa5   :  { %417 = vsyncpa [#allocation5 + $0x1], 1 }

</bundles_post_ra>
